<compile_context>
chip_gen: v5e
topology: v5e:2x2
jax: 0.10.0
libtpu: 0.0.40
codegen_flags: <defaults>
</compile_context>

<pallas_src>
import functools
import math

import jax
import jax.numpy as jnp
from jax import lax
from jax.experimental import pallas as pl
from jax.experimental.pallas import tpu as pltpu


# VMEM budget: ~3/4 of physical (48 MiB on v7x's 64 MiB, 96 MiB on v5e/v6e).
try:
    _VMEM_LIMIT = int(min(pltpu.get_tpu_info().vmem_capacity_bytes * 3 // 4,
                          96 * 1024 * 1024))
except Exception:  # pragma: no cover - conservative fallback
    _VMEM_LIMIT = 48 * 1024 * 1024


# --------------------------------------------------------------------------
# Tiling helpers.
# --------------------------------------------------------------------------
def _row_tile(n, target=512):
    """Row tile for (n, D) projections; big blocks amortize per-step overhead."""
    if n <= target:
        return n
    for t in range(target, 7, -8):
        if n % t == 0:
            return t
    return n


def _attn_tiles(s, max_tile=512):
    """Return (s_padded, tile).  tile divides s_padded; prefers 256-multiples."""
    if s <= max_tile:
        return s, s
    s_pad = ((s + 127) // 128) * 128          # pad to a lane-legal multiple
    for t in (512, 256, 128):
        if t <= max_tile and s_pad % t == 0:
            return s_pad, t
    return s_pad, 128


def _out_row_tile(s_pad, target=1024):
    """Larger q tile for the output projection (cuts Wo re-streaming)."""
    if s_pad <= target:
        return s_pad
    for t in (1024, 512, 256, 128):
        if t <= target and s_pad % t == 0:
            return t
    return s_pad


# --------------------------------------------------------------------------
# Kernel 1: row-tiled linear, y = bf16(x) @ W + b.
# Used for the fused QKV projection ((D, 3D) weight), fused KV ((D, 2D)) and
# any single projection.  The bf16 cast of the activations happens in-kernel.
# --------------------------------------------------------------------------
def _linear_kernel(x_ref, w_ref, b_ref, o_ref):
    x = x_ref[...].astype(jnp.bfloat16)
    y = jnp.dot(x, w_ref[...], preferred_element_type=jnp.float32) + b_ref[...]
    o_ref[...] = y.astype(o_ref.dtype)


def _row_linear(x, w, b, out_dtype=jnp.bfloat16):
    R, d_in = x.shape
    d_out = w.shape[1]
    tr = _row_tile(R)
    nr = R // tr
    # TODO(synk): for very large d_model (>= ~2048) the resident (d_in, d_out)
    # bf16 weight should additionally be K/N-tiled in 256-multiples to fit
    # v7x's 64 MiB VMEM; fine at typical transformer sizes.
    return pl.pallas_call(
        _linear_kernel,
        out_shape=jax.ShapeDtypeStruct((R, d_out), out_dtype),
        grid_spec=pltpu.PrefetchScalarGridSpec(
            num_scalar_prefetch=0,
            grid=(nr,),
            in_specs=[pl.BlockSpec((tr, d_in), lambda r: (r, 0)),
                      pl.BlockSpec((d_in, d_out), lambda r: (0, 0)),
                      pl.BlockSpec((1, d_out), lambda r: (0, 0))],
            out_specs=pl.BlockSpec((tr, d_out), lambda r: (r, 0))),
        compiler_params=pltpu.CompilerParams(
            dimension_semantics=("parallel",),
            vmem_limit_bytes=_VMEM_LIMIT),
    )(x, w, b)


# --------------------------------------------------------------------------
# Kernel 2: flash-style attention, grid = (B, h, q_tiles, kv_tiles).
# Scalar-prefetched flags[b, kv_tile] skip fully-masked KV tiles.
# --------------------------------------------------------------------------
def _flash_attn_kernel(*refs, mask_kind):
    if mask_kind == "none":
        flags_ref, q_ref, k_ref, v_ref, o_ref, m_sc, l_sc, acc_sc = refs
        bias_ref = None
    else:
        flags_ref, q_ref, k_ref, v_ref, bias_ref, o_ref, m_sc, l_sc, acc_sc = refs

    b = pl.program_id(0)
    ki = pl.program_id(3)

    @pl.when(ki == 0)
    def _init():
        m_sc[...] = jnp.full_like(m_sc, -jnp.inf)
        l_sc[...] = jnp.zeros_like(l_sc)
        acc_sc[...] = jnp.zeros_like(acc_sc)

    # Skip KV tiles whose keys are all masked/padding (compute skip; the DMA of
    # the tile still happens).  Tile 0 is always processed so m/l stay finite.
    @pl.when(jnp.logical_or(ki == 0, flags_ref[b, ki] > 0))
    def _compute():
        q = q_ref[...]                        # (tq, d_k) bf16; 1/sqrt(d_k) folded into Wq
        k = k_ref[...]                        # (tk, d_k) bf16
        v = v_ref[...]                        # (tk, d_k) bf16

        # scores = q @ k^T by contracting d_k of both operands (no explicit .T).
        s = lax.dot_general(q, k, (((1,), (1,)), ((), ())),
                            preferred_element_type=jnp.float32)   # (tq, tk) f32

        if mask_kind == "kv":
            s = s + bias_ref[...]                          # (1, tk) f32 additive bias
        elif mask_kind == "full":
            s = s + bias_ref[...].astype(jnp.float32)      # (tq, tk) bf16 bias

        # Online (streaming) softmax over the kv axis.
        m_prev = m_sc[...]
        m_new = jnp.maximum(m_prev, jnp.max(s, axis=-1, keepdims=True))
        alpha = jnp.exp(m_prev - m_new)
        p = jnp.exp(s - m_new)
        l_sc[...] = alpha * l_sc[...] + jnp.sum(p, axis=-1, keepdims=True)
        acc_sc[...] = alpha * acc_sc[...] + jnp.dot(
            p.astype(v.dtype), v, preferred_element_type=jnp.float32)
        m_sc[...] = m_new

    @pl.when(ki == pl.num_programs(3) - 1)
    def _finalize():
        # Exact division (per review) -- the (tq, 1) reciprocal is negligible.
        o_ref[...] = (acc_sc[...] / l_sc[...]).astype(o_ref.dtype)


# --------------------------------------------------------------------------
# Kernel 3: output projection fused with the head merge.
# grid = (B, q_tiles, h); h is an "arbitrary" reduction axis:
#   out[b, s, :] = sum_h ctx[b, h, s, :] @ Wo_r[h] + bo
# so no (B,h,S,d_k) -> (B,S,D) host transpose is needed.
# --------------------------------------------------------------------------
def _out_proj_kernel(ctx_ref, wo_ref, bo_ref, o_ref, acc_ref):
    hd = pl.program_id(2)

    @pl.when(hd == 0)
    def _init():
        acc_ref[...] = jnp.zeros_like(acc_ref)

    acc_ref[...] += jnp.dot(ctx_ref[...], wo_ref[...],
                            preferred_element_type=jnp.float32)

    @pl.when(hd == pl.num_programs(2) - 1)
    def _finalize():
        o_ref[...] = (acc_ref[...] + bo_ref[...]).astype(o_ref.dtype)


# --------------------------------------------------------------------------
# jitted implementation (static config resolved by the dispatcher below).
# --------------------------------------------------------------------------
@functools.partial(jax.jit, static_argnames=("h", "same_qkv", "kv_same",
                                             "mask_kind", "max_seq_tile"))
def _mha_impl(query, key, value, mask, params, *, h, same_qkv, kv_same,
              mask_kind, max_seq_tile):
    B, S, D = query.shape
    Skv = key.shape[1]
    assert D % h == 0
    assert key.shape == value.shape
    d_k = D // h
    scale = 1.0 / math.sqrt(d_k)

    # PyTorch Linear stores W as (out, in); kernels want (in, out).
    # Fold 1/sqrt(d_k) into Wq/bq so the kernels apply no explicit scale.
    wq = (params["wq"].T * scale).astype(jnp.bfloat16)
    wk = params["wk"].T.astype(jnp.bfloat16)
    wv = params["wv"].T.astype(jnp.bfloat16)
    bq = (params["bq"] * scale).reshape(1, D).astype(jnp.float32)
    bk = params["bk"].reshape(1, D).astype(jnp.float32)
    bv = params["bv"].reshape(1, D).astype(jnp.float32)

    xq = query.reshape(B * S, D)          # stays f32; cast to bf16 in-kernel
    xkv = key.reshape(B * Skv, D)

    # ---------------- stage 1: (fused) projections ----------------
    if same_qkv:
        w_qkv = jnp.concatenate([wq, wk, wv], axis=1)        # (D, 3D)
        b_qkv = jnp.concatenate([bq, bk, bv], axis=1)        # (1, 3D)
        qkv = _row_linear(xq, w_qkv, b_qkv)                   # (R, 3D) bf16
        q_flat, k_flat, v_flat = qkv[:, :D], qkv[:, D:2 * D], qkv[:, 2 * D:]
    else:
        q_flat = _row_linear(xq, wq, bq)
        if kv_same:
            w_kv = jnp.concatenate([wk, wv], axis=1)          # (D, 2D)
            b_kv = jnp.concatenate([bk, bv], axis=1)
            kv = _row_linear(xkv, w_kv, b_kv)
            k_flat, v_flat = kv[:, :D], kv[:, D:]
        else:
            k_flat = _row_linear(xkv, wk, bk)
            v_flat = _row_linear(value.reshape(B * Skv, D), wv, bv)

    # Head split (fused XLA slice+reshape+transpose under jit).
    # TODO(synk): writing q/k/v head-major straight from the projection kernel
    # would need an in-kernel (rows, h*d_k) -> (h, rows, d_k) repack; kept in
    # XLA for lowering robustness.
    def to_heads(x2d, s):
        return x2d.reshape(B, s, h, d_k).transpose(0, 2, 1, 3)   # (B, h, s, d_k)

    qh = to_heads(q_flat, S)
    kh = to_heads(k_flat, Skv)
    vh = to_heads(v_flat, Skv)

    # ---------------- seq tiling / padding ----------------
    sq_pad, tq = _attn_tiles(S, max_seq_tile)
    sk_pad, tk = _attn_tiles(Skv, max_seq_tile)
    nq, nk = sq_pad // tq, sk_pad // tk

    if sq_pad > S:
        qh = jnp.pad(qh, ((0, 0), (0, 0), (0, sq_pad - S), (0, 0)))
    if sk_pad > Skv:
        kh = jnp.pad(kh, ((0, 0), (0, 0), (0, sk_pad - Skv), (0, 0)))
        vh = jnp.pad(vh, ((0, 0), (0, 0), (0, sk_pad - Skv), (0, 0)))

    # ---------------- mask -> additive bias + kv-tile flags ----------------
    eff_mask_kind = mask_kind
    if eff_mask_kind == "none" and sk_pad > Skv:
        eff_mask_kind = "kv"            # padded keys must still be masked

    bias = None
    if eff_mask_kind == "kv":
        if mask is None:
            valid = jnp.ones((B, Skv), dtype=bool)
        else:
            m = mask[:, 0, :] if mask.ndim == 3 else mask
            valid = jnp.broadcast_to(m != 0, (B, Skv))
        if sk_pad > Skv:
            valid = jnp.pad(valid, ((0, 0), (0, sk_pad - Skv)),
                            constant_values=False)
        bias = jnp.where(valid, 0.0, -1e9).astype(jnp.float32)
        bias = bias.reshape(B, 1, sk_pad)
        flags = valid.reshape(B, nk, tk).any(axis=-1).astype(jnp.int32)
    elif eff_mask_kind == "full":
        m = jnp.broadcast_to(mask, (B, S, Skv))
        bias = jnp.where(m != 0, 0.0, -1e9).astype(jnp.float32)
        if sk_pad > Skv:
            bias = jnp.pad(bias, ((0, 0), (0, 0), (0, sk_pad - Skv)),
                           constant_values=-1e9)
        if sq_pad > S:
            bias = jnp.pad(bias, ((0, 0), (0, sq_pad - S), (0, 0)))
        bias = bias.astype(jnp.bfloat16)   # halves full-mask DMA
        flags = jnp.ones((B, nk), dtype=jnp.int32)
    else:
        flags = jnp.ones((B, nk), dtype=jnp.int32)

    # ---------------- stage 2: flash-style attention ----------------
    q_spec = pl.BlockSpec((None, None, tq, d_k),
                          lambda b_, hd, qi, ki, fl: (b_, hd, qi, 0))
    kv_spec = pl.BlockSpec((None, None, tk, d_k),
                           lambda b_, hd, qi, ki, fl: (b_, hd, ki, 0))
    o_spec = pl.BlockSpec((None, None, tq, d_k),
                          lambda b_, hd, qi, ki, fl: (b_, hd, qi, 0))

    in_specs = [q_spec, kv_spec, kv_spec]
    args = [qh, kh, vh]
    if eff_mask_kind == "kv":
        in_specs.append(pl.BlockSpec((None, 1, tk),
                                     lambda b_, hd, qi, ki, fl: (b_, 0, ki)))
        args.append(bias)
    elif eff_mask_kind == "full":
        in_specs.append(pl.BlockSpec((None, tq, tk),
                                     lambda b_, hd, qi, ki, fl: (b_, qi, ki)))
        args.append(bias)

    # TODO(synk): pipeline_mode=pl.Buffered(3) on kv_spec would deepen the KV
    # prefetch on v6e; left at default double-buffering for portability.
    ctx = pl.pallas_call(
        functools.partial(_flash_attn_kernel, mask_kind=eff_mask_kind),
        out_shape=jax.ShapeDtypeStruct((B, h, sq_pad, d_k), jnp.bfloat16),
        grid_spec=pltpu.PrefetchScalarGridSpec(
            num_scalar_prefetch=1,
            grid=(B, h, nq, nk),
            in_specs=in_specs,
            out_specs=o_spec,
            scratch_shapes=[pltpu.VMEM((tq, 1), jnp.float32),     # m
                            pltpu.VMEM((tq, 1), jnp.float32),     # l
                            pltpu.VMEM((tq, d_k), jnp.float32)]),  # acc
        compiler_params=pltpu.CompilerParams(
            dimension_semantics=("parallel", "parallel", "parallel", "arbitrary"),
            vmem_limit_bytes=_VMEM_LIMIT),
    )(flags, *args)

    # ---------------- stage 3: output projection (+ head merge) ----------------
    wo_r = params["wo"].T.reshape(h, d_k, D).astype(jnp.bfloat16)  # (h, d_k, D)
    bo = params["bo"].reshape(1, D).astype(jnp.float32)

    tqo = _out_row_tile(sq_pad)
    nqo = sq_pad // tqo

    out_pad = pl.pallas_call(
        _out_proj_kernel,
        out_shape=jax.ShapeDtypeStruct((B, sq_pad, D), jnp.float32),
        grid_spec=pltpu.PrefetchScalarGridSpec(
            num_scalar_prefetch=0,
            grid=(B, nqo, h),
            in_specs=[pl.BlockSpec((None, None, tqo, d_k),
                                   lambda b_, qi, hd: (b_, hd, qi, 0)),
                      pl.BlockSpec((None, d_k, D),
                                   lambda b_, qi, hd: (hd, 0, 0)),
                      pl.BlockSpec((1, D), lambda b_, qi, hd: (0, 0))],
            out_specs=pl.BlockSpec((None, tqo, D),
                                   lambda b_, qi, hd: (b_, qi, 0)),
            scratch_shapes=[pltpu.VMEM((tqo, D), jnp.float32)]),
        compiler_params=pltpu.CompilerParams(
            dimension_semantics=("parallel", "parallel", "arbitrary"),
            vmem_limit_bytes=_VMEM_LIMIT),
    )(ctx, wo_r, bo)

    return out_pad[:, :S, :] if sq_pad > S else out_pad


def multi_headed_attention(query, key, value, params, *, h, mask=None,
                           max_seq_tile=512):
    """Forward of the PyTorch MultiHeadedAttention module (eval mode).

    params: dict with wq,bq,wk,bk,wv,bv,wo,bo in PyTorch (out, in) layout.
    mask: None, key-padding mask (B, S_kv)/(B, 1, S_kv), or a full mask
          broadcastable to (B, S_q, S_kv); 0 means masked (masked_fill(mask==0)).
    """
    same_qkv = (query is key) and (key is value)
    kv_same = key is value
    if mask is None:
        mask_kind = "none"
    else:
        mask = jnp.asarray(mask)
        if mask.ndim == 2 or (mask.ndim == 3 and mask.shape[1] == 1):
            mask_kind = "kv"
        else:
            mask_kind = "full"
    return _mha_impl(query, key, value, mask, params, h=h, same_qkv=same_qkv,
                     kv_same=kv_same, mask_kind=mask_kind,
                     max_seq_tile=max_seq_tile)


# --------------------------------------------------------------------------
# Pure-JAX f32 reference mirroring the PyTorch forward (eval mode).
# --------------------------------------------------------------------------
def _reference_mha(query, key, value, params, *, h, mask=None):
    B, S, D = query.shape
    d_k = D // h

    def lin(x, w, b):  # PyTorch Linear: x @ W.T + b
        return x @ w.T + b

    q = lin(query, params["wq"], params["bq"]).reshape(B, -1, h, d_k).transpose(0, 2, 1, 3)
    k = lin(key,   params["wk"], params["bk"]).reshape(B, -1, h, d_k).transpose(0, 2, 1, 3)
    v = lin(value, params["wv"], params["bv"]).reshape(B, -1, h, d_k).transpose(0, 2, 1, 3)

    scores = jnp.einsum("bhqd,bhkd->bhqk", q, k) / math.sqrt(d_k)
    if mask is not None:
        m = jnp.asarray(mask)
        if m.ndim == 2:
            m = m[:, None, :]
        m = m[:, None, ...]                      # add head axis
        scores = jnp.where(m == 0, -1e9, scores)
    p = jax.nn.softmax(scores, axis=-1)
    x = jnp.einsum("bhqk,bhkd->bhqd", p, v)
    x = x.transpose(0, 2, 1, 3).reshape(B, -1, h * d_k)
    return lin(x, params["wo"], params["bo"])


if __name__ == "__main__":
    B, S, D, H = 2, 8, 32, 4

    key0 = jax.random.PRNGKey(0)
    keys = jax.random.split(key0, 16)
    bound = 1.0 / math.sqrt(D)  # PyTorch nn.Linear default init range

    def u(k, shape):
        return jax.random.uniform(k, shape, jnp.float32, -bound, bound)

    params = {
        "wq": u(keys[0], (D, D)), "bq": u(keys[1], (D,)),
        "wk": u(keys[2], (D, D)), "bk": u(keys[3], (D,)),
        "wv": u(keys[4], (D, D)), "bv": u(keys[5], (D,)),
        "wo": u(keys[6], (D, D)), "bo": u(keys[7], (D,)),
    }

    x = jax.random.normal(keys[8], (B, S, D), jnp.float32)       # self-attn input
    mem = jax.random.normal(keys[9], (B, 10, D), jnp.float32)    # encoder memory
    q_in = jax.random.normal(keys[10], (B, S, D), jnp.float32)
    k_in = jax.random.normal(keys[11], (B, S, D), jnp.float32)
    v_in = jax.random.normal(keys[12], (B, S, D), jnp.float32)

    tol = dict(atol=5e-2, rtol=5e-2)   # bf16 MXU inputs

    # 1) Self-attention (q is k is v) with compact key-padding mask -> fused QKV.
    kv_mask = jnp.ones((B, 1, S), dtype=jnp.int32).at[1, :, -2:].set(0)
    out = jax.block_until_ready(
        multi_headed_attention(x, x, x, params, h=H, mask=kv_mask))
    ref = _reference_mha(x, x, x, params, h=H, mask=kv_mask)
    assert out.shape == (B, S, D)
    assert jnp.allclose(out, ref, **tol), "self-attn / kv-mask mismatch"

    # 2) Self-attention with a full (q, k) mask.
    full_mask = jnp.broadcast_to(kv_mask, (B, S, S))
    out = jax.block_until_ready(
        multi_headed_attention(x, x, x, params, h=H, mask=full_mask))
    ref = _reference_mha(x, x, x, params, h=H, mask=full_mask)
    assert jnp.allclose(out, ref, **tol), "self-attn / full-mask mismatch"

    # 3) Cross-attention (query != key, key is value), memory length 10.
    mem_mask = jnp.ones((B, 1, 10), dtype=jnp.int32).at[0, :, -3:].set(0)
    out = jax.block_until_ready(
        multi_headed_attention(q_in, mem, mem, params, h=H, mask=mem_mask))
    ref = _reference_mha(q_in, mem, mem, params, h=H, mask=mem_mask)
    assert out.shape == (B, S, D)
    assert jnp.allclose(out, ref, **tol), "cross-attn mismatch"

    # 4) Fully distinct q/k/v, no mask.
    out = jax.block_until_ready(
        multi_headed_attention(q_in, k_in, v_in, params, h=H, mask=None))
    ref = _reference_mha(q_in, k_in, v_in, params, h=H, mask=None)
    assert jnp.allclose(out, ref, **tol), "no-mask mismatch"

    # 5) Longer sequence exercising seq padding (200 -> 256), multiple KV tiles
    #    and the fully-masked-tile skip (batch 1 masks all keys >= 100).
    S2 = 200
    x2 = jax.random.normal(keys[13], (B, S2, D), jnp.float32)
    kv_mask2 = jnp.ones((B, 1, S2), dtype=jnp.int32).at[1, :, 100:].set(0)
    out2 = jax.block_until_ready(
        multi_headed_attention(x2, x2, x2, params, h=H, mask=kv_mask2,
                               max_seq_tile=128))
    ref2 = _reference_mha(x2, x2, x2, params, h=H, mask=kv_mask2)
    assert out2.shape == (B, S2, D)
    assert jnp.allclose(out2, ref2, **tol), "padded long-seq mismatch"

    print("KERNEL_OK")
</pallas_src>

<mosaic_0001>
module attributes {stable_mosaic.version = 11 : i64} {
  func.func @_linear_kernel(%arg0: i32, %arg1: memref<16x32xf32, #tpu.memory_space<vmem>>, %arg2: memref<32x96xbf16, #tpu.memory_space<vmem>>, %arg3: memref<1x96xf32, #tpu.memory_space<vmem>>, %arg4: memref<16x96xbf16, #tpu.memory_space<vmem>>) attributes {dimension_semantics = [#tpu.dimension_semantics<parallel>], iteration_bounds = array<i64: 1>, scalar_prefetch = 0 : i64, scratch_operands = 0 : i64, tpu.core_type = #tpu.core_type<tc>, window_params = [{transform_indices = @transform_0, window_bounds = array<i64: 16, 32>}, {pipeline_mode = #tpu.pipeline_mode<synchronous>, transform_indices = @transform_1, window_bounds = array<i64: 32, 96>}, {pipeline_mode = #tpu.pipeline_mode<synchronous>, transform_indices = @transform_2, window_bounds = array<i64: 1, 96>}, {transform_indices = @transform_3, window_bounds = array<i64: 16, 96>}]} {
    %c0 = arith.constant 0 : index
    %c0_0 = arith.constant 0 : index
    %0 = vector.load %arg1[%c0, %c0_0] : memref<16x32xf32, #tpu.memory_space<vmem>>, vector<16x32xf32>
    %1 = arith.truncf %0 : vector<16x32xf32> to vector<16x32xbf16>
    %c0_1 = arith.constant 0 : index
    %c0_2 = arith.constant 0 : index
    %2 = vector.load %arg2[%c0_1, %c0_2] : memref<32x96xbf16, #tpu.memory_space<vmem>>, vector<32x96xbf16>
    %cst = arith.constant dense<0.000000e+00> : vector<16x96xf32>
    %3 = tpu.matmul %1, %2, %cst {dimension_numbers = #tpu.dot_dimension_numbers<[1], [0], [0], [1], [0, 0, 1, 1], [], []>} : vector<16x32xbf16>, vector<32x96xbf16>, vector<16x96xf32> -> vector<16x96xf32>
    %c0_3 = arith.constant 0 : index
    %c0_4 = arith.constant 0 : index
    %4 = vector.load %arg3[%c0_3, %c0_4] : memref<1x96xf32, #tpu.memory_space<vmem>>, vector<1x96xf32>
    %5 = vector.broadcast %4 : vector<1x96xf32> to vector<16x96xf32>
    %6 = arith.addf %3, %5 : vector<16x96xf32>
    %7 = arith.truncf %6 : vector<16x96xf32> to vector<16x96xbf16>
    %c0_5 = arith.constant 0 : index
    %c0_6 = arith.constant 0 : index
    %8 = vector.load %arg4[%c0_5, %c0_6] : memref<16x96xbf16, #tpu.memory_space<vmem>>, vector<16x96xbf16>
    tpu.vector_store %arg4[%c0_5, %c0_6], %7 {strides = array<i32>} : memref<16x96xbf16, #tpu.memory_space<vmem>>, vector<16x96xbf16>,
    return
  }
  func.func @transform_0(%arg0: i32) -> (i32, i32) {
    %c0_i32 = arith.constant 0 : i32
    %c0_i32_0 = arith.constant 0 : i32
    return %arg0, %c0_i32 : i32, i32
  }
  func.func @transform_1(%arg0: i32) -> (i32, i32) {
    %c0_i32 = arith.constant 0 : i32
    %c0_i32_0 = arith.constant 0 : i32
    %c0_i32_1 = arith.constant 0 : i32
    return %c0_i32, %c0_i32_0 : i32, i32
  }
  func.func @transform_2(%arg0: i32) -> (i32, i32) {
    %c0_i32 = arith.constant 0 : i32
    %c0_i32_0 = arith.constant 0 : i32
    %c0_i32_1 = arith.constant 0 : i32
    return %c0_i32, %c0_i32_0 : i32, i32
  }
  func.func @transform_3(%arg0: i32) -> (i32, i32) {
    %c0_i32 = arith.constant 0 : i32
    %c0_i32_0 = arith.constant 0 : i32
    return %arg0, %c0_i32 : i32, i32
  }
}

module attributes {stable_mosaic.version = 11 : i64} {
  func.func @_out_proj_kernel(%arg0: i32, %arg1: i32, %arg2: i32, %arg3: memref<1x1x8x8xbf16, #tpu.memory_space<vmem>>, %arg4: memref<1x8x32xbf16, #tpu.memory_space<vmem>>, %arg5: memref<1x32xf32, #tpu.memory_space<vmem>>, %arg6: memref<1x8x32xf32, #tpu.memory_space<vmem>>, %arg7: memref<8x32xf32, #tpu.memory_space<vmem>>) attributes {dimension_semantics = [#tpu.dimension_semantics<parallel>, #tpu.dimension_semantics<parallel>, #tpu.dimension_semantics<arbitrary>], iteration_bounds = array<i64: 2, 1, 4>, scalar_prefetch = 0 : i64, scratch_operands = 1 : i64, tpu.core_type = #tpu.core_type<tc>, window_params = [{transform_indices = @transform_0, window_bounds = array<i64: 1, 1, 8, 8>}, {transform_indices = @transform_1, window_bounds = array<i64: 1, 8, 32>}, {pipeline_mode = #tpu.pipeline_mode<synchronous>, transform_indices = @transform_2, window_bounds = array<i64: 1, 32>}, {transform_indices = @transform_3, window_bounds = array<i64: 1, 8, 32>}]} {
    %c0_i32 = arith.constant 0 : i32
    %0 = arith.cmpi eq, %arg2, %c0_i32 : i32
    %1 = arith.extui %0 : i1 to i32
    %c0_i32_0 = arith.constant 0 : i32
    %2 = arith.cmpi ne, %1, %c0_i32_0 : i32
    scf.if %2 {
      %cst_12 = arith.constant 0.000000e+00 : f32
      %14 = vector.broadcast %cst_12 : f32 to vector<8x32xf32>
      %c0_13 = arith.constant 0 : index
      %c0_14 = arith.constant 0 : index
      %15 = vector.load %arg7[%c0_13, %c0_14] : memref<8x32xf32, #tpu.memory_space<vmem>>, vector<8x32xf32>
      tpu.vector_store %arg7[%c0_13, %c0_14], %14 {strides = array<i32>} : memref<8x32xf32, #tpu.memory_space<vmem>>, vector<8x32xf32>,
    } else {
    }
    %c0 = arith.constant 0 : index
    %c0_1 = arith.constant 0 : index
    %3 = vector.load %arg7[%c0, %c0_1] : memref<8x32xf32, #tpu.memory_space<vmem>>, vector<8x32xf32>
    %c0_2 = arith.constant 0 : index
    %c0_3 = arith.constant 0 : index
    %c0_4 = arith.constant 0 : index
    %c0_5 = arith.constant 0 : index
    %4 = vector.load %arg3[%c0_2, %c0_3, %c0_4, %c0_5] : memref<1x1x8x8xbf16, #tpu.memory_space<vmem>>, vector<1x1x8x8xbf16>
    %5 = vector.shape_cast %4 : vector<1x1x8x8xbf16> to vector<8x8xbf16>
    %c0_6 = arith.constant 0 : index
    %c0_7 = arith.constant 0 : index
    %c0_8 = arith.constant 0 : index
    %6 = vector.load %arg4[%c0_6, %c0_7, %c0_8] : memref<1x8x32xbf16, #tpu.memory_space<vmem>>, vector<1x8x32xbf16>
    %7 = vector.shape_cast %6 : vector<1x8x32xbf16> to vector<8x32xbf16>
    %cst = arith.constant dense<0.000000e+00> : vector<8x32xf32>
    %8 = tpu.matmul %5, %7, %cst {dimension_numbers = #tpu.dot_dimension_numbers<[1], [0], [0], [1], [0, 0, 1, 1], [], []>} : vector<8x8xbf16>, vector<8x32xbf16>, vector<8x32xf32> -> vector<8x32xf32>
    %9 = arith.addf %3, %8 : vector<8x32xf32>
    %c0_9 = arith.constant 0 : index
    %c0_10 = arith.constant 0 : index
    %10 = vector.load %arg7[%c0_9, %c0_10] : memref<8x32xf32, #tpu.memory_space<vmem>>, vector<8x32xf32>
    tpu.vector_store %arg7[%c0_9, %c0_10], %9 {strides = array<i32>} : memref<8x32xf32, #tpu.memory_space<vmem>>, vector<8x32xf32>,
    %c3_i32 = arith.constant 3 : i32
    %11 = arith.cmpi eq, %arg2, %c3_i32 : i32
    %12 = arith.extui %11 : i1 to i32
    %c0_i32_11 = arith.constant 0 : i32
    %13 = arith.cmpi ne, %12, %c0_i32_11 : i32
    scf.if %13 {
      %c0_12 = arith.constant 0 : index
      %c0_13 = arith.constant 0 : index
      %14 = vector.load %arg7[%c0_12, %c0_13] : memref<8x32xf32, #tpu.memory_space<vmem>>, vector<8x32xf32>
      %c0_14 = arith.constant 0 : index
      %c0_15 = arith.constant 0 : index
      %15 = vector.load %arg5[%c0_14, %c0_15] : memref<1x32xf32, #tpu.memory_space<vmem>>, vector<1x32xf32>
      %16 = vector.broadcast %15 : vector<1x32xf32> to vector<8x32xf32>
      %17 = arith.addf %14, %16 : vector<8x32xf32>
      %c0_16 = arith.constant 0 : index
      %c0_17 = arith.constant 0 : index
      %c0_18 = arith.constant 0 : index
      %18 = vector.load %arg6[%c0_16, %c0_17, %c0_18] : memref<1x8x32xf32, #tpu.memory_space<vmem>>, vector<1x8x32xf32>
      %19 = vector.shape_cast %18 : vector<1x8x32xf32> to vector<8x32xf32>
      %20 = vector.shape_cast %17 : vector<8x32xf32> to vector<1x8x32xf32>
      tpu.vector_store %arg6[%c0_16, %c0_17, %c0_18], %20 {strides = array<i32>} : memref<1x8x32xf32, #tpu.memory_space<vmem>>, vector<1x8x32xf32>,
    } else {
    }
    return
  }
  func.func @transform_0(%arg0: i32, %arg1: i32, %arg2: i32) -> (i32, i32, i32, i32) {
    %c0_i32 = arith.constant 0 : i32
    %c0_i32_0 = arith.constant 0 : i32
    return %arg0, %arg2, %arg1, %c0_i32 : i32, i32, i32, i32
  }
  func.func @transform_1(%arg0: i32, %arg1: i32, %arg2: i32) -> (i32, i32, i32) {
    %c0_i32 = arith.constant 0 : i32
    %c0_i32_0 = arith.constant 0 : i32
    %c0_i32_1 = arith.constant 0 : i32
    return %arg2, %c0_i32, %c0_i32_0 : i32, i32, i32
  }
  func.func @transform_2(%arg0: i32, %arg1: i32, %arg2: i32) -> (i32, i32) {
    %c0_i32 = arith.constant 0 : i32
    %c0_i32_0 = arith.constant 0 : i32
    %c0_i32_1 = arith.constant 0 : i32
    return %c0_i32, %c0_i32_0 : i32, i32
  }
  func.func @transform_3(%arg0: i32, %arg1: i32, %arg2: i32) -> (i32, i32, i32) {
    %c0_i32 = arith.constant 0 : i32
    %c0_i32_0 = arith.constant 0 : i32
    return %arg0, %arg1, %c0_i32 : i32, i32, i32
  }
}

module attributes {stable_mosaic.version = 11 : i64} {
  func.func @_flash_attn_kernel(%arg0: i32, %arg1: i32, %arg2: i32, %arg3: i32, %arg4: memref<2x1xi32, #tpu.memory_space<smem>>, %arg5: memref<1x1x8x8xbf16, #tpu.memory_space<vmem>>, %arg6: memref<1x1x8x8xbf16, #tpu.memory_space<vmem>>, %arg7: memref<1x1x8x8xbf16, #tpu.memory_space<vmem>>, %arg8: memref<1x1x8xf32, #tpu.memory_space<vmem>>, %arg9: memref<1x1x8x8xbf16, #tpu.memory_space<vmem>>, %arg10: memref<8x1xf32, #tpu.memory_space<vmem>>, %arg11: memref<8x1xf32, #tpu.memory_space<vmem>>, %arg12: memref<8x8xf32, #tpu.memory_space<vmem>>) attributes {dimension_semantics = [#tpu.dimension_semantics<parallel>, #tpu.dimension_semantics<parallel>, #tpu.dimension_semantics<parallel>, #tpu.dimension_semantics<arbitrary>], iteration_bounds = array<i64: 2, 4, 1, 1>, scalar_prefetch = 1 : i64, scratch_operands = 3 : i64, tpu.core_type = #tpu.core_type<tc>, window_params = [{transform_indices = @transform_0, window_bounds = array<i64: 1, 1, 8, 8>}, {transform_indices = @transform_1, window_bounds = array<i64: 1, 1, 8, 8>}, {transform_indices = @transform_2, window_bounds = array<i64: 1, 1, 8, 8>}, {transform_indices = @transform_3, window_bounds = array<i64: 1, 1, 8>}, {transform_indices = @transform_4, window_bounds = array<i64: 1, 1, 8, 8>}]} {
    %c0_i32 = arith.constant 0 : i32
    %0 = arith.cmpi eq, %arg3, %c0_i32 : i32
    %1 = arith.extui %0 : i1 to i32
    %c0_i32_0 = arith.constant 0 : i32
    %2 = arith.cmpi ne, %1, %c0_i32_0 : i32
    scf.if %2 {
      %cst = arith.constant 0xFF800000 : f32
      %14 = vector.broadcast %cst : f32 to vector<8x1xf32>
      %c0 = arith.constant 0 : index
      %c0_6 = arith.constant 0 : index
      %15 = vector.load %arg10[%c0, %c0_6] : memref<8x1xf32, #tpu.memory_space<vmem>>, vector<8x1xf32>
      tpu.vector_store %arg10[%c0, %c0_6], %14 {strides = array<i32>} : memref<8x1xf32, #tpu.memory_space<vmem>>, vector<8x1xf32>,
      %cst_7 = arith.constant 0.000000e+00 : f32
      %16 = vector.broadcast %cst_7 : f32 to vector<8x1xf32>
      %c0_8 = arith.constant 0 : index
      %c0_9 = arith.constant 0 : index
      %17 = vector.load %arg11[%c0_8, %c0_9] : memref<8x1xf32, #tpu.memory_space<vmem>>, vector<8x1xf32>
      tpu.vector_store %arg11[%c0_8, %c0_9], %16 {strides = array<i32>} : memref<8x1xf32, #tpu.memory_space<vmem>>, vector<8x1xf32>,
      %cst_10 = arith.constant 0.000000e+00 : f32
      %18 = vector.broadcast %cst_10 : f32 to vector<8x8xf32>
      %c0_11 = arith.constant 0 : index
      %c0_12 = arith.constant 0 : index
      %19 = vector.load %arg12[%c0_11, %c0_12] : memref<8x8xf32, #tpu.memory_space<vmem>>, vector<8x8xf32>
      tpu.vector_store %arg12[%c0_11, %c0_12], %18 {strides = array<i32>} : memref<8x8xf32, #tpu.memory_space<vmem>>, vector<8x8xf32>,
    } else {
    }
    %c0_i32_1 = arith.constant 0 : i32
    %3 = arith.cmpi eq, %arg3, %c0_i32_1 : i32
    %4 = arith.index_cast %arg0 : i32 to index
    %5 = arith.index_cast %arg3 : i32 to index
    %6 = memref.load %arg4[%4, %5] : memref<2x1xi32, #tpu.memory_space<smem>>
    %c0_i32_2 = arith.constant 0 : i32
    %7 = arith.cmpi sgt, %6, %c0_i32_2 : i32
    %8 = arith.ori %3, %7 : i1
    %9 = arith.extui %8 : i1 to i32
    %c0_i32_3 = arith.constant 0 : i32
    %10 = arith.cmpi ne, %9, %c0_i32_3 : i32
    scf.if %10 {
      %c0 = arith.constant 0 : index
      %c0_6 = arith.constant 0 : index
      %c0_7 = arith.constant 0 : index
      %c0_8 = arith.constant 0 : index
      %14 = vector.load %arg5[%c0, %c0_6, %c0_7, %c0_8] : memref<1x1x8x8xbf16, #tpu.memory_space<vmem>>, vector<1x1x8x8xbf16>
      %15 = vector.shape_cast %14 : vector<1x1x8x8xbf16> to vector<8x8xbf16>
      %c0_9 = arith.constant 0 : index
      %c0_10 = arith.constant 0 : index
      %c0_11 = arith.constant 0 : index
      %c0_12 = arith.constant 0 : index
      %16 = vector.load %arg6[%c0_9, %c0_10, %c0_11, %c0_12] : memref<1x1x8x8xbf16, #tpu.memory_space<vmem>>, vector<1x1x8x8xbf16>
      %17 = vector.shape_cast %16 : vector<1x1x8x8xbf16> to vector<8x8xbf16>
      %c0_13 = arith.constant 0 : index
      %c0_14 = arith.constant 0 : index
      %c0_15 = arith.constant 0 : index
      %c0_16 = arith.constant 0 : index
      %18 = vector.load %arg7[%c0_13, %c0_14, %c0_15, %c0_16] : memref<1x1x8x8xbf16, #tpu.memory_space<vmem>>, vector<1x1x8x8xbf16>
      %19 = vector.shape_cast %18 : vector<1x1x8x8xbf16> to vector<8x8xbf16>
      %cst = arith.constant dense<0.000000e+00> : vector<8x8xf32>
      %20 = tpu.matmul %15, %17, %cst {dimension_numbers = #tpu.dot_dimension_numbers<[1], [1], [0], [0], [0, 0, 1, 0], [], []>} : vector<8x8xbf16>, vector<8x8xbf16>, vector<8x8xf32> -> vector<8x8xf32>
      %c0_17 = arith.constant 0 : index
      %c0_18 = arith.constant 0 : index
      %c0_19 = arith.constant 0 : index
      %21 = vector.load %arg8[%c0_17, %c0_18, %c0_19] : memref<1x1x8xf32, #tpu.memory_space<vmem>>, vector<1x1x8xf32>
      %22 = vector.shape_cast %21 : vector<1x1x8xf32> to vector<1x8xf32>
      %23 = vector.broadcast %22 : vector<1x8xf32> to vector<8x8xf32>
      %24 = arith.addf %20, %23 : vector<8x8xf32>
      %c0_20 = arith.constant 0 : index
      %c0_21 = arith.constant 0 : index
      %25 = vector.load %arg10[%c0_20, %c0_21] : memref<8x1xf32, #tpu.memory_space<vmem>>, vector<8x1xf32>
      %cst_22 = arith.constant dense<0xFF800000> : vector<8xf32>
      %26 = vector.multi_reduction <maximumf>, %24, %cst_22 [1] : vector<8x8xf32> to vector<8xf32>
      %27 = vector.shape_cast %26 : vector<8xf32> to vector<8x1xf32>
      %28 = arith.maximumf %25, %27 : vector<8x1xf32>
      %29 = arith.subf %25, %28 : vector<8x1xf32>
      %30 = math.exp %29 : vector<8x1xf32>
      %31 = vector.broadcast %28 : vector<8x1xf32> to vector<8x8xf32>
      %32 = arith.subf %24, %31 : vector<8x8xf32>
      %33 = math.exp %32 : vector<8x8xf32>
      %c0_23 = arith.constant 0 : index
      %c0_24 = arith.constant 0 : index
      %34 = vector.load %arg11[%c0_23, %c0_24] : memref<8x1xf32, #tpu.memory_space<vmem>>, vector<8x1xf32>
      %35 = arith.mulf %30, %34 : vector<8x1xf32>
      %cst_25 = arith.constant dense<0.000000e+00> : vector<8xf32>
      %36 = vector.multi_reduction <add>, %33, %cst_25 [1] : vector<8x8xf32> to vector<8xf32>
      %37 = vector.shape_cast %36 : vector<8xf32> to vector<8x1xf32>
      %38 = arith.addf %35, %37 : vector<8x1xf32>
      %c0_26 = arith.constant 0 : index
      %c0_27 = arith.constant 0 : index
      %39 = vector.load %arg11[%c0_26, %c0_27] : memref<8x1xf32, #tpu.memory_space<vmem>>, vector<8x1xf32>
      tpu.vector_store %arg11[%c0_26, %c0_27], %38 {strides = array<i32>} : memref<8x1xf32, #tpu.memory_space<vmem>>, vector<8x1xf32>,
      %c0_28 = arith.constant 0 : index
      %c0_29 = arith.constant 0 : index
      %40 = vector.load %arg12[%c0_28, %c0_29] : memref<8x8xf32, #tpu.memory_space<vmem>>, vector<8x8xf32>
      %41 = vector.broadcast %30 : vector<8x1xf32> to vector<8x8xf32>
      %42 = arith.mulf %41, %40 : vector<8x8xf32>
      %43 = arith.truncf %33 : vector<8x8xf32> to vector<8x8xbf16>
      %cst_30 = arith.constant dense<0.000000e+00> : vector<8x8xf32>
      %44 = tpu.matmul %43, %19, %cst_30 {dimension_numbers = #tpu.dot_dimension_numbers<[1], [0], [0], [1], [0, 0, 1, 1], [], []>} : vector<8x8xbf16>, vector<8x8xbf16>, vector<8x8xf32> -> vector<8x8xf32>
      %45 = arith.addf %42, %44 : vector<8x8xf32>
      %c0_31 = arith.constant 0 : index
      %c0_32 = arith.constant 0 : index
      %46 = vector.load %arg12[%c0_31, %c0_32] : memref<8x8xf32, #tpu.memory_space<vmem>>, vector<8x8xf32>
      tpu.vector_store %arg12[%c0_31, %c0_32], %45 {strides = array<i32>} : memref<8x8xf32, #tpu.memory_space<vmem>>, vector<8x8xf32>,
      %c0_33 = arith.constant 0 : index
      %c0_34 = arith.constant 0 : index
      %47 = vector.load %arg10[%c0_33, %c0_34] : memref<8x1xf32, #tpu.memory_space<vmem>>, vector<8x1xf32>
      tpu.vector_store %arg10[%c0_33, %c0_34], %28 {strides = array<i32>} : memref<8x1xf32, #tpu.memory_space<vmem>>, vector<8x1xf32>,
    } else {
    }
    %c0_i32_4 = arith.constant 0 : i32
    %11 = arith.cmpi eq, %arg3, %c0_i32_4 : i32
    %12 = arith.extui %11 : i1 to i32
    %c0_i32_5 = arith.constant 0 : i32
    %13 = arith.cmpi ne, %12, %c0_i32_5 : i32
    scf.if %13 {
      %c0 = arith.constant 0 : index
      %c0_6 = arith.constant 0 : index
      %14 = vector.load %arg12[%c0, %c0_6] : memref<8x8xf32, #tpu.memory_space<vmem>>, vector<8x8xf32>
      %c0_7 = arith.constant 0 : index
      %c0_8 = arith.constant 0 : index
      %15 = vector.load %arg11[%c0_7, %c0_8] : memref<8x1xf32, #tpu.memory_space<vmem>>, vector<8x1xf32>
      %16 = vector.broadcast %15 : vector<8x1xf32> to vector<8x8xf32>
      %17 = arith.divf %14, %16 : vector<8x8xf32>
      %18 = arith.truncf %17 : vector<8x8xf32> to vector<8x8xbf16>
      %c0_9 = arith.constant 0 : index
      %c0_10 = arith.constant 0 : index
      %c0_11 = arith.constant 0 : index
      %c0_12 = arith.constant 0 : index
      %19 = vector.load %arg9[%c0_9, %c0_10, %c0_11, %c0_12] : memref<1x1x8x8xbf16, #tpu.memory_space<vmem>>, vector<1x1x8x8xbf16>
      %20 = vector.shape_cast %19 : vector<1x1x8x8xbf16> to vector<8x8xbf16>
      %21 = vector.shape_cast %18 : vector<8x8xbf16> to vector<1x1x8x8xbf16>
      tpu.vector_store %arg9[%c0_9, %c0_10, %c0_11, %c0_12], %21 {strides = array<i32>} : memref<1x1x8x8xbf16, #tpu.memory_space<vmem>>, vector<1x1x8x8xbf16>,
    } else {
    }
    return
  }
  func.func @transform_0(%arg0: i32, %arg1: i32, %arg2: i32, %arg3: i32, %arg4: memref<2x1xi32, #tpu.memory_space<smem>>) -> (i32, i32, i32, i32) {
    %c0_i32 = arith.constant 0 : i32
    %c0_i32_0 = arith.constant 0 : i32
    return %arg0, %arg1, %arg2, %c0_i32 : i32, i32, i32, i32
  }
  func.func @transform_1(%arg0: i32, %arg1: i32, %arg2: i32, %arg3: i32, %arg4: memref<2x1xi32, #tpu.memory_space<smem>>) -> (i32, i32, i32, i32) {
    %c0_i32 = arith.constant 0 : i32
    %c0_i32_0 = arith.constant 0 : i32
    return %arg0, %arg1, %arg3, %c0_i32 : i32, i32, i32, i32
  }
  func.func @transform_2(%arg0: i32, %arg1: i32, %arg2: i32, %arg3: i32, %arg4: memref<2x1xi32, #tpu.memory_space<smem>>) -> (i32, i32, i32, i32) {
    %c0_i32 = arith.constant 0 : i32
    %c0_i32_0 = arith.constant 0 : i32
    return %arg0, %arg1, %arg3, %c0_i32 : i32, i32, i32, i32
  }
  func.func @transform_3(%arg0: i32, %arg1: i32, %arg2: i32, %arg3: i32, %arg4: memref<2x1xi32, #tpu.memory_space<smem>>) -> (i32, i32, i32) {
    %c0_i32 = arith.constant 0 : i32
    %c0_i32_0 = arith.constant 0 : i32
    return %arg0, %c0_i32, %arg3 : i32, i32, i32
  }
  func.func @transform_4(%arg0: i32, %arg1: i32, %arg2: i32, %arg3: i32, %arg4: memref<2x1xi32, #tpu.memory_space<smem>>) -> (i32, i32, i32, i32) {
    %c0_i32 = arith.constant 0 : i32
    %c0_i32_0 = arith.constant 0 : i32
    return %arg0, %arg1, %arg2, %c0_i32 : i32, i32, i32, i32
  }
}

</mosaic_0001>

<bundles_post_ra>
// kernel: _mha_impl.5
= control target key start
LH: loop header
LB: loop body
LE: loop exit
PB: predicated region body
PF: predicated region fallthrough
CT: control target
= control target key end

     0   :  { %8 = vsyncpa [#allocation4], 0  ;;  %s730_s0 = inlined_call_operand.vmem [shape: bf16[2,4,8,8], index: 0, kind: input, shape index: {}]   ;;  %s731_s1 = inlined_call_operand.vmem [shape: bf16[4,8,32], index: 1, kind: input, shape index: {}]   ;;  %s732_s2 = inlined_call_operand.vmem [shape: f32[1,32], index: 2, kind: input, shape index: {}]   ;;  %s733_s3 = inlined_call_operand.hbm [shape: f32[2,8,32], index: 3, kind: output, shape index: {}]  }
   0x1   :  { %10 = vsyncpa [#allocation4 + $0x1], 0  ;;  %s592_s12 = smov 0   ;;  %s594_s13 = smov 0  }
   0x2   :  { %s596_s14 = smov 0   ;;  %s598_s15 = smov 0  }
   0x3   :  { %s600_s16 = smov 0   ;;  %s602_s17 = smov 0  }
   0x4   :  { %s604_s18 = smov 0   ;;  %s606_s19 = smov 0  }
   0x5 LB: > { %s386_s20 = sadd.s32 4294967295, %s569_s19   ;;  %s387_s21 = sadd.s32 4294967294, %s569_s19   ;;  %s569_s19 = sphi %s606_s19, %s16_s19   ;;  %s565_s18 = sphi %s604_s18, %s745_s18   ;;  %s561_s17 = sphi %s602_s17, %s744_s17   ;;  %s557_s16 = sphi %s600_s16, %s743_s16   ;;  %s553_s15 = sphi %s598_s15, %s742_s15   ;;  %s549_s14 = sphi %s596_s14, %s741_s14   ;;  %s545_s13 = sphi %s594_s13, %s740_s13   ;;  %s541_s12 = sphi %s592_s12, %s739_s12  }
   0x6   : > { %s28_s22 = sadd.s32 1, %s561_s17  ;;  %s35_s23 = sadd.s32 1, %s565_s18 }
   0x7   : > { %p29_p0 = scmp.ge.s32.totalorder %s28_s22, 4  ;;  %p131_p1 = scmp.ne.s32.totalorder %s549_s14, %s545_s13 }
   0x8   : > { %p132_p2 = scmp.eq.s32.totalorder %s386_s20, 7  ;;  %p137_p4 = scmp.ne.s32.totalorder %s545_s13, %s541_s12 }
   0x9   : > { %s747_s22 = smov (%p29_p0, %s28_s22), 0  ;;  %s749_s23 = smov (!%p29_p0, %s35_s23), %s565_s18 }
   0xa   : > { %p641_p3 = por %p132_p2, %p131_p1  ;;  %p37_p5 = scmp.ge.s32.totalorder %s749_s23, 2 }
   0xb   : > { %p138_p6 = scmp.eq.s32.totalorder %s387_s21, 7  ;;  %p390_p7 = scmp.ge.s32.totalorder %s569_s19, 1 }
   0xc   : > { %p180_p8 = scmp.lt.s32.totalorder %s569_s19, 9  ;;  %s751_s23 = smov (%p37_p5, %s749_s23), 0 }
   0xd   : > { %736 = sst [smem:[#allocation6_spill]] %s751_s23  ;;  %p651_p9 = por %p138_p6, %p137_p4 }
   0xe   : > { %p181_p10 = pnand %p390_p7, %p180_p8  ;;  %s116_s26 = ssub.s32 %s565_s18, %s751_s23 }
   0xf   : > { %s121_s27 = sadd.s32 1, %s549_s14  ;;  %p119_p11 = scmp.eq.s32.totalorder %s116_s26, 0 }
  0x10   : > { %184 = sbr.rel (%p181_p10) target bundleno = 189 (0xbd), region = 32  ;;  %s211_s29 = sand.u32 (!%p181_p10), 1, %s545_s13  }
  0x11   : > { %s659_s28 = scalar_select %p119_p11, %s549_s14, %s121_s27  }
  0x12   : > { %p214_p12 = scmp.lt.s32.totalorder (!%p181_p10), %s557_s16, 1  ;;  %s665_s30 = sshll.u32 (!%p181_p10), %s211_s29, 3 }
  0x13   : > { %p216_p13 = scmp.lt.s32.totalorder (!%p181_p10), %s553_s15, 3  ;;  %s213_s23 = scalar_lea.vmem (!%p181_p10), [#allocation3], %s665_s30 }
  0x14   : > { %p395_p0 = scmp.ne.s32.totalorder (!%p181_p10), %s553_s15, 0 }
  0x15   : > { %s215_s4 = scalar_select %p214_p12, %s557_s16, 1 }
  0x16   : > { %s217_s5 = scalar_select %p216_p13, %s553_s15, 3 }
  0x17   : > { %s392_s6 = sshll.u32 %s215_s4, 2  ;;  %233 = sbr.rel (%p395_p0) target bundleno = 30 (0x1e), region = 36 }
  0x18   : > { %s222_s7 = sadd.s32 %s392_s6, %s217_s5  ;;  %s394_s8 = sshll.u32 %s217_s5, 2 }
  0x19   : > { %s393_s9 = sshll.u32 %s222_s7, 2  ;;  %s228_s20 = scalar_lea.vmem %s731_s1, %s394_s8 }
  0x1a   : > { %s224_s27 = scalar_lea.vmem %s730_s0, %s393_s9 }
  0x1c   : > { %vm234_vm0 = vcmask 261120   ;;  %v571_v0 = vmov 0.0  }
  0x1d   : > { %235 = vst.msk [vmem:[#allocation2] sm:$0xff] %vm234_vm0, %v571_v0 }
  0x1e PF: > { %v238_v1 = vld [vmem:[%s228_s20] sm:$0xf]  ;;  %vm243_vm1 = vcmask 1043456   ;;  %vm239_vm2 = vcmask 64512   ;;  %vm261_vm3 = vcmask 261120   ;;  %p397_p1 = scmp.ne.s32.totalorder %s553_s15, 3 }
  0x1f   : > { %v245_v2 = vsel %vm243_vm1, %v238_v1, 0  ;;  %v237_v3 = vld [vmem:[%s224_s27] sm:$0xf] }
  0x20   : > { %254 = vmatpush.bf16.msra.mxu0 %v245_v2 }
  0x23   : > { %396 = vmatmul.msk.bf16.vlgmr.msra.gmra.mxu0 %vm239_vm2, %v237_v3 }
  0x24   : > { %v236_v4 = vld [vmem:[#allocation2] sm:$0xff] }
  0xa0   : > { %v256_v5 = vpop.f32.mrf.mxu0 }
  0xa1   : > { %v260_v6 = vadd.f32 %v256_v5, %v236_v4 }
  0xa3   : > { %262 = vst.msk [vmem:[#allocation2] sm:$0xff] %vm261_vm3, %v260_v6 }
  0xa4   : > { %266 = sbr.rel (%p397_p1) target bundleno = 174 (0xae), region = 40 }
  0xa8   : > { %v258_v7 = vpop.f32.mrf.mxu0 }
  0xa9   : > { %v474_v9 = vld [vmem:[%s732_s2] ss:$0 sm:$0xff] }
  0xaa   : > { %v267_v8 = vld [vmem:[#allocation2] sm:$0xff] }
  0xab   : > { %v272_v10 = vadd.f32 %v474_v9, %v267_v8 }
  0xad   : > { %273 = vst.msk [vmem:[%s213_s23] sm:$0xff] %vm261_vm3, %v272_v10 }
  0xae PF: > { %s399_s6 = sshll.u32 %s557_s16, 3  ;;  %s288_s9 = sshll.u32 %s213_s23, 4  ;;  %s289_s9 = int_to_ptr.vmem [resolvable:$true] %s288_s9 }
  0xaf   : > { %s286_s15 = scalar_lea.hbm %s733_s3, %s399_s6  ;;  %s275_s11 = scalar_lea.sflag [#allocation4], %s211_s29 }
  0xb0   : > { %s290_s10 = sshll.u32 %s286_s15, 4  ;;  %s495_s27 = scalar_lea.hbm %s733_s3, 16  ;;  %s291_s10 = int_to_ptr.hbm [resolvable:$true] %s290_s10 }
  0xb1   : > { %s489_s20 = sshra.s32 %s291_s10, 4  ;;  %s490_s20 = int_to_ptr.hbm [resolvable:$true] %s489_s20 }
  0xb2   : > { %s491_s21 = scalar_lea.hbm %s490_s20, 8  ;;  %p496_p6 = scmp.lt.s32.totalorder %s490_s20, %s733_s3 }
  0xb3   : > { %p492_p2 = scmp.ne.s32.totalorder %s490_s20, %s491_s21  ;;  %p497_p7 = scmp.lt.s32.totalorder %s495_s27, %s491_s21 }
  0xb5   : > { %p493_p4 = pnand %p492_p2, %p641_p3  ;;  %p498_p8 = por %p497_p7, %p496_p6 }
  0xb7   : > { %p494_p5 = pneg %p493_p4 }
  0xb9   : > { %p499_p10 = pnand %p498_p8, %p494_p5 }
  0xbb   : > { %502 = shalt.err (!%p499_p10)
}
  0xbc   : > { %402 = dma.vmem_to_hbm [thread:$0]  (%p641_p3), %s289_s9, 128, %s291_s10, %s275_s11  }
  0xbd PF: > { %p408_p11 = scmp.ge.s32.totalorder %s569_s19, 2  ;;  %s302_s23 = sand.u32 1, %s541_s12  }
  0xbe   : > { %s303_s29 = scalar_lea.sflag [#allocation4], %s302_s23 }
  0xbf   : > { %p405_p12 = pnand %p408_p11, %p651_p9 }
  0xc1   : > { %p406_p13 = pneg %p405_p12 }
  0xc3   : > { %536 = dma.done.wait (%p406_p13), %s303_s29, 128  }
  0xc4   : > { %538 = vsyncadd (%p406_p13), %s303_s29, 4294967168  ;;  %s16_s19 = sadd.s32 1, %s569_s19   ;;  %s738_s24 = sld [smem:[#allocation6_spill]] }
  0xc5   : > { %p13_p0 = scmp.ge.s32.totalorder %s16_s19, 10   ;;  %s739_s12 = smov %s545_s13 }
  0xc6   : > { %s740_s13 = smov %s549_s14  ;;  %s741_s14 = smov %s659_s28 }
  0xc7   : > { %s742_s15 = smov %s561_s17  ;;  %s743_s16 = smov %s565_s18 }
  0xc8   : > { %s744_s17 = smov %s747_s22  ;;  %15 = sbr.rel (!%p13_p0) target bundleno = 5 (0x5), region = 78 }
  0xca   : > { %s745_s18 = smov %s738_s24 }
  0xcd   :  { %309 = vsyncpa [#allocation4], 1 }
  0xce   :  { %311 = vsyncpa [#allocation4 + $0x1], 1 }

// kernel: _mha_impl.3
= control target key start
LH: loop header
LB: loop body
LE: loop exit
PB: predicated region body
PF: predicated region fallthrough
CT: control target
= control target key end

     0   :  { %vm38_vm0 = vcmask 261120   ;;  %vm58_vm1 = vcmask 781312   ;;  %s118_s1 = inlined_call_operand.vmem [shape: bf16[32,96], index: 1, kind: input, shape index: {}]   ;;  %s119_s0 = inlined_call_operand.vmem [shape: f32[16,32], index: 0, kind: input, shape index: {}]   ;;  %s120_s2 = inlined_call_operand.vmem [shape: f32[1,96], index: 2, kind: input, shape index: {}]   ;;  %s121_s3 = inlined_call_operand.vmem [shape: bf16[16,96], index: 3, kind: output, shape index: {}]  }
   0x1   :  { %v75_v0 = vld [vmem:[%s118_s1 + $0x8] sm:$0xff]  ;;  %v74_v1 = vld [vmem:[%s118_s1] sm:$0xff] }
   0x2   :  { %48 = vmatpush.bf16.msra.mxu0 %v75_v0  ;;  %v15_v2 = vld [vmem:[%s119_s0] sm:$0xff]  ;;  %v16_v3 = vld [vmem:[%s119_s0 + $0x8] sm:$0xff] }
   0x3   :  { %v17_v4 = vpack.c.bf16 %v16_v3, %v15_v2  ;;  %v76_v5 = vld [vmem:[%s120_s2] ss:$0 sm:$0xff] }
   0x6   :  { %49 = vmatpush.bf16.msra.mxu0 %v74_v1 }
   0x9   :  { %73 = vmatmul.msk.bf16.vlgmr.msra.gmra.mxu0 %vm38_vm0, %v17_v4 }
  0x86   :  { %v51_v6 = vpop.f32.mrf.mxu0 }
  0x87   :  { %v52_v7 = vadd.f32 %v76_v5, %v51_v6 }
  0x89   :  { %v56_v8 = vpack.c.bf16 %v52_v7, %v52_v7 }
  0x8b   :  { %59 = vst.msk [vmem:[%s121_s3] sm:$0xf] %vm58_vm1, %v56_v8 }
  0x8e   :  { %v53_v9 = vpop.f32.mrf.mxu0 }
  0x8f   :  { %v54_v10 = vadd.f32 %v76_v5, %v53_v9 }
  0x91   :  { %v57_v11 = vpack.c.bf16 %v54_v10, %v54_v10 }
  0x93   :  { %60 = vst.msk [vmem:[%s121_s3 + $0x4] sm:$0xf] %vm58_vm1, %v57_v11 }

// kernel: _mha_impl.4
= control target key start
LH: loop header
LB: loop body
LE: loop exit
PB: predicated region body
PF: predicated region fallthrough
CT: control target
= control target key end

     0   :  { %s798_s21 = smov [#allocation6]   ;;  %s912_s0 = inlined_call_operand.vmem [shape: s32[2,1], index: 0, kind: input, shape index: {}]   ;;  %s913_s1 = inlined_call_operand.vmem [shape: bf16[2,4,8,8], index: 1, kind: input, shape index: {}]   ;;  %s914_s2 = inlined_call_operand.vmem [shape: bf16[2,4,8,8], index: 2, kind: input, shape index: {}]   ;;  %s915_s3 = inlined_call_operand.vmem [shape: bf16[2,4,8,8], index: 3, kind: input, shape index: {}]   ;;  %s916_s4 = inlined_call_operand.vmem [shape: f32[2,1,8], index: 4, kind: input, shape index: {}]   ;;  %s917_s5 = inlined_call_operand.vmem [shape: bf16[2,4,8,8], index: 5, kind: output, shape index: {}]  }
   0x1   :  { %s11_s20 = sshll.u32 %s912_s0, 4  ;;  %s12_s20 = int_to_ptr.vmem [resolvable:$true] %s11_s20 }
   0x2   :  { %14 = dma.vmem_to_smem %s12_s20, 32, %s798_s21, [#allocation5] }
   0x3   :  { %776 = dma.done.wait [#allocation5], 32 }
   0x4   :  { %777 = vsyncadd [#allocation5], 4294967264 }
   0x5   :  { %17 = sfence }
   0x6   :  { %s835_s22 = smov 0   ;;  %s837_s23 = smov 0  }
   0x7   :  { %s839_s24 = smov 0   ;;  %s841_s25 = smov 0  }
   0x8   :  { %s843_s26 = smov 0  }
   0x9 LB: > { %s45_s0 = sadd.s32 1, %s788_s24  ;;  %s49_s27 = sadd.s32 1, %s792_s25  ;;  %s796_s26 = sphi %s843_s26, %s23_s26   ;;  %s792_s25 = sphi %s841_s25, %s921_s25   ;;  %s788_s24 = sphi %s839_s24, %s920_s24   ;;  %s784_s23 = sphi %s837_s23, %s919_s23   ;;  %s780_s22 = sphi %s835_s22, %s918_s22  }
   0xa   : > { %p47_p0 = scmp.ge.s32.totalorder %s45_s0, 4  ;;  %p676_p1 = scmp.ge.s32.totalorder %s796_s26, 1 }
   0xb   : > { %p264_p2 = scmp.lt.s32.totalorder %s796_s26, 9 }
   0xc   : > { %s923_s0 = smov (%p47_p0, %s45_s0), 0  ;;  %s925_s27 = smov (!%p47_p0, %s49_s27), %s792_s25 }
   0xd   : > { %p265_p3 = pnand %p676_p1, %p264_p2  ;;  %p51_p4 = scmp.ge.s32.totalorder %s925_s27, 2 }
   0xe   : > { %p330_p5 = scmp.lt.s32.totalorder (!%p265_p3), %s784_s23, 1  ;;  %p332_p6 = scmp.lt.s32.totalorder (!%p265_p3), %s780_s22, 3 }
   0xf   : > { %s927_s27 = smov (%p51_p4, %s925_s27), 0  ;;  %268 = sbr.rel (%p265_p3) target bundleno = 671 (0x29f), region = 36 }
  0x14   : > { %vm388_vm0 = vcmask 64512   ;;  %v799_v0 = vmov 0.0   ;;  %s929_s23 = smov (!%p330_p5, %s784_s23), 1  ;;  %s931_s22 = smov (!%p332_p6, %s780_s22), 3  ;;  %vm385_vm1 = vcmask 7168   ;;  %v800_v4 = vmov -inf  }
  0x15   : > { %389 = vst.msk [vmem:[#allocation4] sm:$0xff] %vm388_vm0, %v799_v0  ;;  %s677_s28 = sshll.u32 %s929_s23, 2  ;;  %s368_s6 = scalar_lea.vmem %s916_s4, %s929_s23  ;;  %v801_v10 = vmov 0   ;;  %vm465_vm2 = vcmask 1043456   ;;  %vm511_vm7 = vcmask 60416  }
  0x16   : > { %s338_s7 = sadd.s32 %s677_s28, %s931_s22  ;;  %386 = vst.msk [vmem:[#allocation2] sm:$0xff] %vm385_vm1, %v800_v4  ;;  %v737_v5 = vld [vmem:[%s368_s6] ss:$0 sm:$0xff]  ;;  %734 = vset.pattern.permute.xlu0 %v801_v10  ;;  %736 = vset.pattern.permute.xlu2 %v801_v10 }
  0x17   : > { %s869_s8 = sshll.u32 %s338_s7, 2  ;;  %387 = vst.msk [vmem:[#allocation3] sm:$0xff] %vm385_vm1, %v799_v0  ;;  %735 = vset.pattern.permute.xlu1 %v801_v10 }
  0x18   : > { %s351_s11 = scalar_lea.vmem %s914_s2, %s869_s8  ;;  %s340_s14 = scalar_lea.vmem %s913_s1, %s869_s8 }
  0x19   : > { %v404_v1 = vld [vmem:[%s351_s11] sm:$0xf]  ;;  %s362_s17 = scalar_lea.vmem %s915_s3, %s869_s8  ;;  %s379_s20 = scalar_lea.vmem %s917_s5, %s869_s8 }
  0x1a   : > { %v415_v2 = vsel %vm388_vm0, %v404_v1, 0  ;;  %v403_v3 = vld [vmem:[%s340_s14] sm:$0xf] }
  0x1b   : > { %424 = vmatpush.bf16.xpose.msra.mxu0 %v415_v2  ;;  %v405_v17 = vld [vmem:[%s362_s17] sm:$0xf] }
  0x1c   : > { %v467_v18 = vsel %vm465_vm2, %v405_v17, 0  ;;  %v454_v29 = vld [vmem:[#allocation4] sm:$0xff] }
  0x1d   : > { %v430_v11 = vld [vmem:[#allocation2] sm:$0xff]  ;;  %476 = vmatpush.bf16.msra.mxu1 %v467_v18 }
  0x1e   : > { %v446_v25 = vld [vmem:[#allocation3] sm:$0xff] }
  0x22   : > { %686 = vmatmul.msk.bf16.vlgmr.msra.gmra.mxu0 %vm388_vm0, %v403_v3 }
  0x9f   : > { %v426_v6 = vpop.f32.mrf.mxu0 }
  0xa0   : > { %v427_v7 = vadd.f32 %v737_v5, %v426_v6 }
  0xa2   : > { %v431_v8 = vsel %vm388_vm0, %v427_v7, -inf }
  0xa3   : > { %432 = vmax.xlane.f32.xlu0 %v431_v8 }
  0xa7   : > { %v428_v9 = vpop.f32.mrf.mxu0 }
 0x116   : > { %v433_v12 = vpop.xlane.xlu0 %432 }
 0x117   : > { %v434_v13 = vmax.f32 %v430_v11, %v433_v12 }
 0x119   : > { %v435_v14 = vsub.f32 %v430_v11, %v434_v13  ;;  %484 = vst.msk [vmem:[#allocation2] sm:$0xff] %vm385_vm1, %v434_v13  ;;  %440 = vperm.xlu0 %734, %v434_v13  }
 0x11b   : > { %v436_v15 = vmul.f32 1.442695, %v435_v14 }
 0x11d   : > { %738 = vpow2.f32 %v436_v15 }
 0x123   : > { %v739_v16 = vpop.eup %738 }
 0x124   : > { %457 = vperm.xlu2 %736, %v739_v16   ;;  %v447_v26 = vmul.f32 %v739_v16, %v446_v25 }
 0x17e   : > { %v458_v30 = vpop.permute.xlu2 %457 }
 0x17f   : > { %v460_v31 = vmul.f32 %v458_v30, %v454_v29 }
 0x18b   : > { %v441_v19 = vpop.permute.xlu0 %440 }
 0x18c   : > { %v443_v20 = vsub.f32 %v427_v7, %v441_v19 }
 0x18e   : > { %v444_v21 = vmul.f32 1.442695, %v443_v20 }
 0x190   : > { %740 = vpow2.f32 %v444_v21 }
 0x196   : > { %v741_v22 = vpop.eup %740 }
 0x197   : > { %v448_v23 = vsel %vm388_vm0, %v741_v22, 0.0  ;;  %v461_v24 = vpack.c.bf16 %v741_v22, %v741_v22 }
 0x198   : > { %449 = vadd.xlane.f32.xlu1 %v448_v23 }
 0x199   : > { %687 = vmatmul.msk.bf16.vlgmr.msra.gmra.mxu1 %vm388_vm0, %v461_v24 }
 0x20b   : > { %v450_v27 = vpop.xlane.xlu1 %449 }
 0x20c   : > { %v451_v28 = vadd.f32 %v450_v27, %v447_v26 }
 0x20e   : > { %453 = vst.msk [vmem:[#allocation3] sm:$0xff] %vm385_vm1, %v451_v28 }
 0x215   : > { %v489_v32 = vld [vmem:[#allocation3] sm:$0xff] }
 0x216   : > { %v478_v33 = vpop.f32.mrf.mxu1  ;;  %492 = vperm.xlu1 %735, %v489_v32  }
 0x217   : > { %v482_v34 = vadd.f32 %v478_v33, %v460_v31 }
 0x219   : > { %483 = vst.msk [vmem:[#allocation4] sm:$0xff] %vm388_vm0, %v482_v34 }
 0x21e   : > { %v480_v35 = vpop.f32.mrf.mxu1 }
 0x220   : > { %v488_v46 = vld [vmem:[#allocation4] sm:$0xff] }
 0x288   : > { %v493_v36 = vpop.permute.xlu1 %492 }
 0x289   : > { %742 = vrcp.f32 %v493_v36  ;;  %v506_v40 = vand.u32 2147483648, %v493_v36  ;;  %v504_v42 = vand.u32 2147483647, %v493_v36  ;;  %vm500_vm4 = vweird.f32 %v493_v36 }
 0x28b   : > { %v507_v44 = vor.u32 1.1754944e-38, %v506_v40  ;;  %vm505_vm6 = vcmp.eq.f32.partialorder %v504_v42, 8.507059e+37 }
 0x28f   : > { %v743_v37 = vpop.eup %742 }
 0x290   : > { %v496_v38 = vmul.f32 %v743_v37, %v493_v36  ;;  %vm501_vm3 = vweird.f32 %v743_v37 }
 0x291   : > { %vm502_vm5 = vmor %vm500_vm4, %vm501_vm3 }
 0x292   : > { %v497_v39 = vsub.f32 1.0, %v496_v38 }
 0x294   : > { %v498_v41 = vmul.f32 %v743_v37, %v497_v39 }
 0x296   : > { %v499_v43 = vadd.f32 %v743_v37, %v498_v41 }
 0x298   : > { %v503_v45 = vsel %vm502_vm5, %v743_v37, %v499_v43 }
 0x299   : > { %v508_v47 = vsel %vm505_vm6, %v507_v44, %v503_v45 }
 0x29a   : > { %v509_v48 = vmul.f32 %v508_v47, %v488_v46 }
 0x29c   : > { %v510_v49 = vpack.c.bf16 %v509_v48, %v509_v48 }
 0x29e   : > { %512 = vst.msk [vmem:[%s379_s20] sm:$0xf] %vm511_vm7, %v510_v49 }
 0x29f PF: > { %s23_s26 = sadd.s32 1, %s796_s26   ;;  %s918_s22 = smov %s788_s24 }
 0x2a0   : > { %p20_p7 = scmp.ge.s32.totalorder %s23_s26, 10   ;;  %s919_s23 = smov %s792_s25 }
 0x2a1   : > { %s920_s24 = smov %s923_s0  ;;  %s921_s25 = smov %s927_s27 }
 0x2a2   :  { %22 = sbr.rel (!%p20_p7) target bundleno = 9 (0x9), region = 87 }

</bundles_post_ra>
